<compile_context>
chip_gen: v6e
topology: v6e:2x2x1
jax: 0.10.0
libtpu: 0.0.40
codegen_flags: <defaults>
</compile_context>

<pallas_src>
import functools

import numpy as np
import jax
import jax.numpy as jnp
from jax.experimental import pallas as pl
from jax.experimental.pallas import tpu as pltpu


def _round_up(x, m):
    return ((x + m - 1) // m) * m


def _fused_heads_kernel(x_ref, w_ref, b_ref, mean_ref, std_ref, *,
                        dist, min_std, init_std, pp):
    """Single MXU pass over the fused (D, 2*pp) weight + dist transforms."""
    x = x_ref[...]                                           # bf16 (blk, D)
    h = jnp.dot(x, w_ref[...],
                preferred_element_type=jnp.float32) + b_ref[...]   # f32 (blk, 2*pp)
    out = h[:, :pp]          # "out" head, 128-lane aligned slice
    raw_std = h[:, pp:]      # "std" head, 128-lane aligned slice

    if dist == 'normal':
        # td.Normal(out, std)
        mean_ref[...] = out
        std_ref[...] = raw_std
    elif dist == 'tanh_normal':
        # mean = 5*tanh(out/5); std = softplus(std + init_std) + min_std
        mean_ref[...] = 5.0 * jnp.tanh(out / 5.0)
        std_ref[...] = jax.nn.softplus(raw_std + init_std) + min_std
    elif dist == 'trunc_normal':
        # std = 2*sigmoid((std + init_std)/2) + min_std; mean = tanh(out)
        mean_ref[...] = jnp.tanh(out)
        std_ref[...] = 2.0 * jax.nn.sigmoid((raw_std + init_std) / 2.0) + min_std
    else:
        raise NotImplementedError(dist)


def _single_head_kernel(x_ref, w_ref, b_ref, mean_ref):
    """'mse' / 'binary' / 'onehot': mean / logits only (no std head)."""
    mean_ref[...] = (jnp.dot(x_ref[...], w_ref[...],
                             preferred_element_type=jnp.float32) + b_ref[...])


def init_dist_layer_params(key, in_dim, shape):
    """Deterministic synthetic init (matches nn.Linear shapes, stored transposed)."""
    p = int(np.prod(shape))
    k1, k2, k3, k4 = jax.random.split(key, 4)
    bound = 1.0 / np.sqrt(in_dim)
    w_out = jax.random.uniform(k1, (in_dim, p), jnp.float32, -bound, bound)
    b_out = jax.random.uniform(k2, (p,), jnp.float32, -bound, bound)
    w_std = jax.random.uniform(k3, (in_dim, p), jnp.float32, -bound, bound)
    b_std = jax.random.uniform(k4, (p,), jnp.float32, -bound, bound)
    return w_out, b_out, w_std, b_std


def _pad_head(w, bias, pp, compute_dtype):
    """Zero-pad a head to pp (multiple of 128) output columns; bf16 W, f32 bias."""
    p = w.shape[1]
    w_pad = jnp.pad(w.astype(compute_dtype), ((0, 0), (0, pp - p)))
    b_pad = jnp.pad(bias.astype(jnp.float32).reshape(1, p), ((0, 0), (0, pp - p)))
    return w_pad, b_pad


def dist_layer_forward(inputs, params, shape, dist='trunc_normal',
                       min_std=0.1, init_std=0.0, block_b=256,
                       compute_dtype=jnp.bfloat16):
    w_out, b_out, w_std, b_std = params
    in_dim = inputs.shape[-1]
    p = int(np.prod(shape))
    pp = _round_up(p, 128)                       # lane-dense head width
    lead = inputs.shape[:-1]
    b = int(np.prod(lead)) if lead else 1
    x = inputs.reshape(b, in_dim).astype(compute_dtype)

    # Batch tiling: one full-array block for small B (single grid step),
    # otherwise large 8-aligned tiles (many blocks -> v7x megacore sharding).
    blk = b if b <= block_b else _round_up(block_b, 8)
    grid = (pl.cdiv(b, blk),)

    needs_std = dist in ('normal', 'tanh_normal', 'trunc_normal')
    compiler_params = pltpu.CompilerParams(
        dimension_semantics=("parallel",),
        # Tiles above are tiny relative to this; 32 MiB is safe on v5e/v6e
        # (128 MiB physical) and is the scoped default on v7x (64 MiB).
        vmem_limit_bytes=32 * 1024 * 1024,
    )

    wo_p, bo_p = _pad_head(w_out, b_out, pp, compute_dtype)

    if needs_std:
        ws_p, bs_p = _pad_head(w_std, b_std, pp, compute_dtype)
        w_fused = jnp.concatenate([wo_p, ws_p], axis=1)        # (D, 2*pp), bf16
        b_fused = jnp.concatenate([bo_p, bs_p], axis=1)        # (1, 2*pp), f32

        kernel = functools.partial(_fused_heads_kernel, dist=dist,
                                   min_std=float(min_std),
                                   init_std=float(init_std), pp=pp)
        mean_p, std_p = pl.pallas_call(
            kernel,
            out_shape=(jax.ShapeDtypeStruct((b, pp), jnp.float32),
                       jax.ShapeDtypeStruct((b, pp), jnp.float32)),
            grid_spec=pltpu.PrefetchScalarGridSpec(
                num_scalar_prefetch=0,
                grid=grid,
                in_specs=[
                    pl.BlockSpec((blk, in_dim), lambda i: (i, 0)),      # x tile
                    pl.BlockSpec((in_dim, 2 * pp), lambda i: (0, 0)),   # fused W
                    pl.BlockSpec((1, 2 * pp), lambda i: (0, 0)),        # fused bias
                ],
                out_specs=[
                    pl.BlockSpec((blk, pp), lambda i: (i, 0)),          # mean tile
                    pl.BlockSpec((blk, pp), lambda i: (i, 0)),          # std tile
                ],
            ),
            compiler_params=compiler_params,
        )(x, w_fused, b_fused)
        mean = mean_p[:, :p]
        std = std_p[:, :p]
    else:
        mean_p = pl.pallas_call(
            _single_head_kernel,
            out_shape=jax.ShapeDtypeStruct((b, pp), jnp.float32),
            grid_spec=pltpu.PrefetchScalarGridSpec(
                num_scalar_prefetch=0,
                grid=grid,
                in_specs=[
                    pl.BlockSpec((blk, in_dim), lambda i: (i, 0)),      # x tile
                    pl.BlockSpec((in_dim, pp), lambda i: (0, 0)),       # W_out
                    pl.BlockSpec((1, pp), lambda i: (0, 0)),            # b_out
                ],
                out_specs=pl.BlockSpec((blk, pp), lambda i: (i, 0)),    # mean tile
            ),
            compiler_params=compiler_params,
        )(x, wo_p, bo_p)
        mean = mean_p[:, :p]
        # 'mse' -> td.Normal(out, 1.0); 'binary'/'onehot' consume raw logits,
        # the unit std here is just API filler produced by XLA (no kernel writeback).
        std = jnp.ones_like(mean)

    # TODO(synk): construction of the torch.distributions objects
    # (ContDist / SampleDist / TruncatedNormal / Bernoulli / OneHotDist) and
    # their sample()/log_prob() have no Pallas equivalent; callers consume the
    # (mean, std) / logits parameters returned here.
    out_shape = lead + tuple(shape)
    return mean.reshape(out_shape), std.reshape(out_shape)


def _reference(inputs, params, shape, dist, min_std, init_std, compute_dtype):
    """Pure-JAX reference using the same bf16-in / f32-accumulate matmul."""
    w_out, b_out, w_std, b_std = params
    lead = inputs.shape[:-1]
    x = inputs.reshape(-1, inputs.shape[-1]).astype(compute_dtype)
    out = jnp.dot(x, w_out.astype(compute_dtype),
                  preferred_element_type=jnp.float32) + b_out
    raw_std = jnp.dot(x, w_std.astype(compute_dtype),
                      preferred_element_type=jnp.float32) + b_std
    if dist in ('mse', 'binary', 'onehot'):
        mean, std = out, jnp.ones_like(out)
    elif dist == 'normal':
        mean, std = out, raw_std
    elif dist == 'tanh_normal':
        mean = 5.0 * jnp.tanh(out / 5.0)
        std = jax.nn.softplus(raw_std + init_std) + min_std
    elif dist == 'trunc_normal':
        mean = jnp.tanh(out)
        std = 2.0 * jax.nn.sigmoid((raw_std + init_std) / 2.0) + min_std
    else:
        raise NotImplementedError(dist)
    return mean.reshape(lead + tuple(shape)), std.reshape(lead + tuple(shape))


if __name__ == "__main__":
    key = jax.random.PRNGKey(0)
    k_in, k_param = jax.random.split(key)

    batch, seq, hidden = 2, 8, 32     # inputs: (batch, seq, hidden) -> B=16 rows
    out_shape = (8,)                  # DistLayer._shape -> P=8 (padded to 128 lanes)
    min_std, init_std = 0.1, 0.0

    inputs = jax.random.normal(k_in, (batch, seq, hidden), jnp.float32)
    params = init_dist_layer_params(k_param, hidden, out_shape)

    ok = True
    for dist in ('trunc_normal', 'tanh_normal', 'normal', 'mse', 'onehot'):
        mean, std = dist_layer_forward(inputs, params, out_shape, dist=dist,
                                       min_std=min_std, init_std=init_std)
        jax.block_until_ready((mean, std))
        mean_ref, std_ref = _reference(inputs, params, out_shape, dist,
                                       min_std, init_std, jnp.bfloat16)
        ok &= bool(jnp.allclose(mean, mean_ref, atol=1e-4, rtol=1e-4))
        ok &= bool(jnp.allclose(std, std_ref, atol=1e-4, rtol=1e-4))

    if ok:
        print("KERNEL_OK")
    else:
        print("KERNEL_MISMATCH")
</pallas_src>

<mosaic_0001>
module attributes {stable_mosaic.version = 11 : i64} {
  func.func @_fused_heads_kernel(%arg0: i32, %arg1: memref<16x32xbf16, #tpu.memory_space<vmem>>, %arg2: memref<32x256xbf16, #tpu.memory_space<vmem>>, %arg3: memref<1x256xf32, #tpu.memory_space<vmem>>, %arg4: memref<16x128xf32, #tpu.memory_space<vmem>>, %arg5: memref<16x128xf32, #tpu.memory_space<vmem>>) attributes {dimension_semantics = [#tpu.dimension_semantics<parallel>], iteration_bounds = array<i64: 1>, scalar_prefetch = 0 : i64, scratch_operands = 0 : i64, tpu.core_type = #tpu.core_type<tc>, window_params = [{transform_indices = @transform_0, window_bounds = array<i64: 16, 32>}, {pipeline_mode = #tpu.pipeline_mode<synchronous>, transform_indices = @transform_1, window_bounds = array<i64: 32, 256>}, {pipeline_mode = #tpu.pipeline_mode<synchronous>, transform_indices = @transform_2, window_bounds = array<i64: 1, 256>}, {transform_indices = @transform_3, window_bounds = array<i64: 16, 128>}, {transform_indices = @transform_4, window_bounds = array<i64: 16, 128>}]} {
    %c0 = arith.constant 0 : index
    %c0_0 = arith.constant 0 : index
    %0 = vector.load %arg1[%c0, %c0_0] : memref<16x32xbf16, #tpu.memory_space<vmem>>, vector<16x32xbf16>
    %c0_1 = arith.constant 0 : index
    %c0_2 = arith.constant 0 : index
    %1 = vector.load %arg2[%c0_1, %c0_2] : memref<32x256xbf16, #tpu.memory_space<vmem>>, vector<32x256xbf16>
    %cst = arith.constant dense<0.000000e+00> : vector<16x256xf32>
    %2 = tpu.matmul %0, %1, %cst {dimension_numbers = #tpu.dot_dimension_numbers<[1], [0], [0], [1], [0, 0, 1, 1], [], []>} : vector<16x32xbf16>, vector<32x256xbf16>, vector<16x256xf32> -> vector<16x256xf32>
    %c0_3 = arith.constant 0 : index
    %c0_4 = arith.constant 0 : index
    %3 = vector.load %arg3[%c0_3, %c0_4] : memref<1x256xf32, #tpu.memory_space<vmem>>, vector<1x256xf32>
    %4 = vector.broadcast %3 : vector<1x256xf32> to vector<16x256xf32>
    %5 = arith.addf %2, %4 : vector<16x256xf32>
    %6 = vector.extract_strided_slice %5 {offsets = [0, 0], sizes = [16, 128], strides = [1, 1]} : vector<16x256xf32> to vector<16x128xf32>
    %7 = vector.extract_strided_slice %5 {offsets = [0, 128], sizes = [16, 128], strides = [1, 1]} : vector<16x256xf32> to vector<16x128xf32>
    %8 = math.tanh %6 : vector<16x128xf32>
    %c0_5 = arith.constant 0 : index
    %c0_6 = arith.constant 0 : index
    %9 = vector.load %arg4[%c0_5, %c0_6] : memref<16x128xf32, #tpu.memory_space<vmem>>, vector<16x128xf32>
    tpu.vector_store %arg4[%c0_5, %c0_6], %8 {strides = array<i32>} : memref<16x128xf32, #tpu.memory_space<vmem>>, vector<16x128xf32>,
    %cst_7 = arith.constant 0.000000e+00 : f32
    %10 = vector.broadcast %cst_7 : f32 to vector<16x128xf32>
    %11 = arith.addf %7, %10 : vector<16x128xf32>
    %cst_8 = arith.constant 2.000000e+00 : f32
    %12 = vector.broadcast %cst_8 : f32 to vector<16x128xf32>
    %13 = arith.divf %11, %12 : vector<16x128xf32>
    %14 = arith.negf %13 : vector<16x128xf32>
    %15 = math.exp %14 : vector<16x128xf32>
    %cst_9 = arith.constant 1.000000e+00 : f32
    %16 = vector.broadcast %cst_9 : f32 to vector<16x128xf32>
    %17 = arith.addf %16, %15 : vector<16x128xf32>
    %18 = arith.divf %16, %17 : vector<16x128xf32>
    %cst_10 = arith.constant 2.000000e+00 : f32
    %19 = vector.broadcast %cst_10 : f32 to vector<16x128xf32>
    %20 = arith.mulf %19, %18 : vector<16x128xf32>
    %cst_11 = arith.constant 1.000000e-01 : f32
    %21 = vector.broadcast %cst_11 : f32 to vector<16x128xf32>
    %22 = arith.addf %20, %21 : vector<16x128xf32>
    %c0_12 = arith.constant 0 : index
    %c0_13 = arith.constant 0 : index
    %23 = vector.load %arg5[%c0_12, %c0_13] : memref<16x128xf32, #tpu.memory_space<vmem>>, vector<16x128xf32>
    tpu.vector_store %arg5[%c0_12, %c0_13], %22 {strides = array<i32>} : memref<16x128xf32, #tpu.memory_space<vmem>>, vector<16x128xf32>,
    return
  }
  func.func @transform_0(%arg0: i32) -> (i32, i32) {
    %c0_i32 = arith.constant 0 : i32
    %c0_i32_0 = arith.constant 0 : i32
    return %arg0, %c0_i32 : i32, i32
  }
  func.func @transform_1(%arg0: i32) -> (i32, i32) {
    %c0_i32 = arith.constant 0 : i32
    %c0_i32_0 = arith.constant 0 : i32
    %c0_i32_1 = arith.constant 0 : i32
    return %c0_i32, %c0_i32_0 : i32, i32
  }
  func.func @transform_2(%arg0: i32) -> (i32, i32) {
    %c0_i32 = arith.constant 0 : i32
    %c0_i32_0 = arith.constant 0 : i32
    %c0_i32_1 = arith.constant 0 : i32
    return %c0_i32, %c0_i32_0 : i32, i32
  }
  func.func @transform_3(%arg0: i32) -> (i32, i32) {
    %c0_i32 = arith.constant 0 : i32
    %c0_i32_0 = arith.constant 0 : i32
    return %arg0, %c0_i32 : i32, i32
  }
  func.func @transform_4(%arg0: i32) -> (i32, i32) {
    %c0_i32 = arith.constant 0 : i32
    %c0_i32_0 = arith.constant 0 : i32
    return %arg0, %c0_i32 : i32, i32
  }
}

</mosaic_0001>

<bundles_post_ra>
// kernel: tpu_custom_call.1
= control target key start
LH: loop header
LB: loop body
LE: loop exit
PB: predicated region body
PF: predicated region fallthrough
CT: control target
= control target key end

     0   :  { %10 = vsyncpa [#allocation3], 0  ;;  %s380_s0 = inlined_call_operand.hbm [shape: bf16[16,32], index: 0, kind: input, shape index: {}]   ;;  %s381_s1 = inlined_call_operand.hbm [shape: bf16[32,256], index: 1, kind: input, shape index: {}]   ;;  %s382_s2 = inlined_call_operand.vmem [shape: f32[1,256], index: 2, kind: input, shape index: {}]   ;;  %s383_s3 = inlined_call_operand.hbm [shape: f32[16,128], index: 3, kind: output, shape index: {0}]   ;;  %s384_s4 = inlined_call_operand.hbm [shape: f32[16,128], index: 4, kind: output, shape index: {1}]  }
   0x1   :  { %11 = vsyncpa [#allocation6], 0 }
   0x2   :  { %12 = vsyncpa [#allocation4], 0 }
   0x3   :  { %13 = vsyncpa [#allocation9], 0  ;;  %s322_s15 = smov [#allocation2]  }
   0x4   :  { %s19_s16 = sshll.u32 %s322_s15, 4  ;;  %s20_s16 = int_to_ptr.vmem [resolvable:$true] %s19_s16 }
   0x5   :  { %s242_s17 = scalar_lea.vmem %s20_s16, 128  ;;  %p247_p1 = scmp.lt.s32.totalorder %s20_s16, %s20_s16 }
   0x6   :  { %p243_p0 = scmp.ne.s32.totalorder %s20_s16, %s242_s17  ;;  %p248_p2 = scmp.lt.s32.totalorder %s242_s17, %s242_s17 }
   0x8   :  { %p249_p3 = por %p248_p2, %p247_p1 }
   0xa   :  { %p250_p4 = pnand %p249_p3, %p243_p0 }
   0xc   :  { %253 = shalt.err (!%p250_p4)
}
   0xd   :  { %s323_s18 = smov 64   ;;  %s324_s19 = smov 4  }
   0xe   :  { %25 = dma.hbm_to_vmem [thread:$0]  %s380_s0, 128, %s20_s16, [#allocation3], %s323_s18, %s323_s18, %s324_s19  }
   0xf   :  { %s325_s22 = smov [#allocation5]  }
  0x10   :  { %s31_s23 = sshll.u32 %s325_s22, 4  ;;  %s32_s23 = int_to_ptr.vmem [resolvable:$true] %s31_s23 }
  0x11   :  { %s262_s24 = scalar_lea.vmem %s32_s23, 512  ;;  %p267_p6 = scmp.lt.s32.totalorder %s32_s23, %s32_s23 }
  0x12   :  { %p263_p5 = scmp.ne.s32.totalorder %s32_s23, %s262_s24  ;;  %p268_p7 = scmp.lt.s32.totalorder %s262_s24, %s262_s24 }
  0x14   :  { %p269_p8 = por %p268_p7, %p267_p6 }
  0x16   :  { %p270_p9 = pnand %p269_p8, %p263_p5 }
  0x18   :  { %273 = shalt.err (!%p270_p9)
}
  0x19   :  { %s326_s25 = smov 128   ;;  %s327_s26 = smov 8  }
  0x1a   :  { %37 = dma.hbm_to_vmem [thread:$0]  %s381_s1, 512, %s32_s23, [#allocation6], %s326_s25, %s326_s25, %s327_s26  }
  0x1b   :  { %314 = dma.done.wait [#allocation3], 128  }
  0x1c   :  { %315 = vsyncadd [#allocation3], 4294967168 }
  0x1d   :  { %316 = dma.done.wait [#allocation6], 512  }
  0x1e   :  { %317 = vsyncadd [#allocation6], 4294966784  ;;  %v328_v0 = vmov 0   ;;  %v215_v1 = vld [vmem:[#allocation5 + $0x14] ss:$8 sps:$4 sm:$0xff]   ;;  %vm90_vm0 = vcmask 261120   ;;  %v55_v6 = vlaneseq }
  0x1f   :  { %126 = vmatprep.mubr.bf16.mxu0 %v328_v0  ;;  %v217_v2 = vld [vmem:[#allocation5 + $0x10] ss:$8 sps:$4 sm:$0xff]   ;;  %106 = vmatprep.subr.bf16.mxu0 %v215_v1  ;;  %v218_v3 = vld [vmem:[#allocation5 + $0x4] ss:$8 sps:$4 sm:$0xff]   ;;  %v220_v4 = vld [vmem:[#allocation5] ss:$8 sps:$4 sm:$0xff]  }
  0x20   :  { %107 = vmatpush1.bf16.msra.mxu0 %v217_v2  ;;  %v221_v5 = vld [vmem:[#allocation2] sm:$0xff]   ;;  %v56_v7 = vshrl.u32 %v55_v6, 7 }
  0x21   :  { %108 = vmatprep.subr.bf16.mxu0 %v218_v3  ;;  %v53_v9 = vld [vmem:[%s382_s2] sm:$0x3]  ;;  %s329_s2 = smov [#allocation7]  }
  0x22   :  { %v57_v8 = vsub.s32 0, %v56_v7  ;;  %v61_v10 = vsub.s32 1, %v56_v7  ;;  %s169_s29 = sshll.u32 %s329_s2, 4  ;;  %s170_s29 = int_to_ptr.vmem [resolvable:$true] %s169_s29 }
  0x23   :  { %s274_s30 = scalar_lea.vmem %s170_s29, 256  ;;  %p279_p11 = scmp.lt.s32.totalorder %s170_s29, %s170_s29 }
  0x24   :  { %109 = vmatpush1.bf16.msra.mxu0 %v220_v4  ;;  %v58_v11 = vrot.slane %v53_v9, %v57_v8  ;;  %v62_v12 = vrot.slane %v53_v9, %v61_v10  ;;  %p275_p10 = scmp.ne.s32.totalorder %s170_s29, %s274_s30  ;;  %p280_p12 = scmp.lt.s32.totalorder %s274_s30, %s274_s30 }
  0x26   :  { %p281_p13 = por %p280_p12, %p279_p11 }
  0x27   :  { %203 = vmatmul.mubr.msk.bf16.vlgmr.msra.gmra.mxu0 %vm90_vm0, %v221_v5 }
  0x28   :  { %p282_p0 = pnand %p281_p13, %p275_p10 }
  0xe7   :  { %v128_v13 = vpop.f32.mrf.mxu0 }
  0xe8   :  { %v129_v14 = vadd.f32 %v128_v13, %v58_v11 }
  0xe9   :  { %v130_v15 = vpop.f32.mrf.mxu0 }
  0xea   :  { %222 = vtanh.f32 %v129_v14  ;;  %v131_v16 = vadd.f32 %v130_v15, %v62_v12 }
  0xeb   :  { %v132_v17 = vpop.f32.mrf.mxu0 }
  0xec   :  { %v204_v18 = vmul.f32 -0.5, %v131_v16  ;;  %v133_v19 = vadd.f32 %v132_v17, %v58_v11 }
  0xed   :  { %v134_v20 = vpop.f32.mrf.mxu0 }
  0xee   :  { %v148_v21 = vmul.f32 1.442695, %v204_v18  ;;  %224 = vtanh.f32 %v133_v19  ;;  %v135_v22 = vadd.f32 %v134_v20, %v62_v12 }
  0xf0   :  { %226 = vpow2.f32 %v148_v21  ;;  %v205_v23 = vmul.f32 -0.5, %v135_v22 }
  0xf2   :  { %v150_v24 = vmul.f32 1.442695, %v205_v23 }
  0xf4   :  { %228 = vpow2.f32 %v150_v24 }
  0xf7   :  { %v223_v25 = vpop.eup %222 }
  0xf8   :  { %139 = vst [vmem:[#allocation7] sm:$0xff] %v223_v25 }
  0xfb   :  { %v225_v26 = vpop.eup %224 }
  0xfc   :  { %140 = vst [vmem:[#allocation7 + $0x8] sm:$0xff] %v225_v26 }
  0xfd   :  { %v227_v27 = vpop.eup %226 }
  0xfe   :  { %285 = shalt.err (!%p282_p0)
}
  0xff   :  { %175 = dma.vmem_to_hbm [thread:$0]  %s170_s29, 256, %s383_s3, [#allocation4], %s326_s25, %s326_s25, %s327_s26   ;;  %v152_v28 = vadd.f32 1.0, %v227_v27 }
 0x100   :  { %s330_s7 = smov [#allocation8]  }
 0x101   :  { %230 = vrcp.f32 %v152_v28  ;;  %v229_v29 = vpop.eup %228  ;;  %s181_s8 = sshll.u32 %s330_s7, 4  ;;  %s182_s8 = int_to_ptr.vmem [resolvable:$true] %s181_s8 }
 0x102   :  { %v153_v30 = vadd.f32 1.0, %v229_v29  ;;  %s294_s9 = scalar_lea.vmem %s182_s8, 256  ;;  %p299_p2 = scmp.lt.s32.totalorder %s182_s8, %s182_s8 }
 0x103   :  { %p295_p1 = scmp.ne.s32.totalorder %s182_s8, %s294_s9  ;;  %p300_p3 = scmp.lt.s32.totalorder %s294_s9, %s294_s9 }
 0x104   :  { %232 = vrcp.f32 %v153_v30 }
 0x105   :  { %p301_p4 = por %p300_p3, %p299_p2 }
 0x107   :  { %p302_p5 = pnand %p301_p4, %p295_p1 }
 0x10e   :  { %v231_v31 = vpop.eup %230 }
 0x10f   :  { %v158_v32 = vmul.f32 2.0, %v231_v31 }
 0x111   :  { %v160_v33 = vadd.f32 0.1, %v158_v32  ;;  %v233_v34 = vpop.eup %232 }
 0x112   :  { %v159_v35 = vmul.f32 2.0, %v233_v34 }
 0x113   :  { %162 = vst [vmem:[#allocation8] sm:$0xff] %v160_v33 }
 0x114   :  { %v161_v36 = vadd.f32 0.1, %v159_v35 }
 0x116   :  { %163 = vst [vmem:[#allocation8 + $0x8] sm:$0xff] %v161_v36 }
 0x117   :  { %305 = shalt.err (!%p302_p5)
}
 0x118   :  { %187 = dma.vmem_to_hbm [thread:$0]  %s182_s8, 256, %s384_s4, [#allocation9], %s326_s25, %s326_s25, %s327_s26  }
 0x119   :  { %318 = dma.done.wait [#allocation4], 256  }
 0x11a   :  { %319 = vsyncadd [#allocation4], 4294967040 }
 0x11b   :  { %320 = dma.done.wait [#allocation9], 256  }
 0x11c   :  { %321 = vsyncadd [#allocation9], 4294967040 }
 0x11d   :  { %194 = vsyncpa [#allocation3], 1 }
 0x11e   :  { %195 = vsyncpa [#allocation6], 1 }
 0x11f   :  { %196 = vsyncpa [#allocation4], 1 }
 0x120   :  { %197 = vsyncpa [#allocation9], 1 }

</bundles_post_ra>
